<compile_context>
chip_gen: v7x
topology: tpu7x:2x2x1
jax: 0.10.0
libtpu: 0.0.40
codegen_flags: <defaults>
</compile_context>

<pallas_src>
import jax
import jax.numpy as jnp
from jax.experimental import pallas as pl
from jax.experimental.pallas import tpu as pltpu

LANES = 128  # lane-dense width for state, per-gate columns, and decoder logits


# -----------------------------------------------------------------------------
# Kernel
# -----------------------------------------------------------------------------
def make_controller_kernel(tanh_c):
    C = float(tanh_c)
    G = LANES  # per-gate lane-aligned column width

    def kernel(x_ref, hx0_ref, cx0_ref,
               we_ref, be_ref,
               wih_ref, whh_ref, bg_ref,
               wd_ref, bd_ref,
               logits_ref, hx_out_ref, cx_out_ref):
        t = pl.program_id(0)

        # hx_out/cx_out have a constant index_map over the step axis, so they are
        # VMEM-resident across all grid steps and serve as the recurrent state.
        @pl.when(t == 0)
        def _():
            hx_out_ref[...] = hx0_ref[...]
            cx_out_ref[...] = cx0_ref[...]

        hx = hx_out_ref[...]          # (B, 128), lanes [hid, 128) are 0
        cx = cx_out_ref[...]          # (B, 128), lanes [hid, 128) are 0
        x = x_ref[0]                  # (B, num_tokens)

        # encoder: embed = x @ We^T + be  (padded to 128 lanes; pad lanes == 0)
        embed = jnp.dot(x, we_ref[...],
                        preferred_element_type=jnp.float32) + be_ref[...]

        # LSTMCell projections (two matmuls, no concat); gates laid out so gate g
        # occupies lanes [g*128, g*128+hid) -> whole-vreg gate slices below.
        gates = (jnp.dot(embed, wih_ref[...], preferred_element_type=jnp.float32)
                 + jnp.dot(hx, whh_ref[...], preferred_element_type=jnp.float32)
                 + bg_ref[...])                                  # (B, 4*128)

        # PyTorch LSTMCell gate order: input, forget, cell(g), output.
        i_g = jax.nn.sigmoid(gates[:, 0 * G:1 * G])
        f_g = jax.nn.sigmoid(gates[:, 1 * G:2 * G])
        g_g = jnp.tanh(gates[:, 2 * G:3 * G])
        o_g = jax.nn.sigmoid(gates[:, 3 * G:4 * G])

        # Pad-lane invariant: gate pads are sigmoid(0)=0.5 / tanh(0)=0 and cx pads
        # start at 0, so cx_new/hx_new pad lanes stay exactly 0 every step.
        cx_new = f_g * cx + i_g * g_g
        hx_new = o_g * jnp.tanh(cx_new)

        # decoder + squash on a lane-dense (B, 128) tile; real logits in lanes [0,2).
        logits = jnp.dot(hx_new, wd_ref[...],
                         preferred_element_type=jnp.float32) + bd_ref[...]
        logits_ref[0] = C * jax.nn.sigmoid(logits)

        hx_out_ref[...] = hx_new
        cx_out_ref[...] = cx_new

    return kernel


# -----------------------------------------------------------------------------
# One-time parameter repack (PyTorch layout -> kernel layout). Do once, reuse.
# -----------------------------------------------------------------------------
def prepare_params(params):
    H, NT = params["encoder_w"].shape          # encoder_w: (hid, num_tokens)
    L = LANES
    assert H <= L, "hid must fit in one 128-lane vreg column per gate"

    we_t = jnp.zeros((NT, L), jnp.float32).at[:, :H].set(params["encoder_w"].T)
    be = jnp.zeros((1, L), jnp.float32).at[0, :H].set(params["encoder_b"])

    wih_t = params["lstm_w_ih"].T              # (H, 4H)
    whh_t = params["lstm_w_hh"].T              # (H, 4H)
    b_sum = params["lstm_b_ih"] + params["lstm_b_hh"]  # (4H,)

    wih_pad = jnp.zeros((L, 4 * L), jnp.float32)
    whh_pad = jnp.zeros((L, 4 * L), jnp.float32)
    bg_pad = jnp.zeros((1, 4 * L), jnp.float32)
    for g in range(4):  # gate g -> its own 128-lane column block
        wih_pad = wih_pad.at[:H, g * L:g * L + H].set(wih_t[:, g * H:(g + 1) * H])
        whh_pad = whh_pad.at[:H, g * L:g * L + H].set(whh_t[:, g * H:(g + 1) * H])
        bg_pad = bg_pad.at[0, g * L:g * L + H].set(b_sum[g * H:(g + 1) * H])

    wd_pad = jnp.zeros((L, L), jnp.float32).at[:H, :2].set(params["decoder_w"].T)
    bd_pad = jnp.zeros((1, L), jnp.float32).at[0, :2].set(params["decoder_b"])

    return {
        "we": we_t, "be": be,
        "wih": wih_pad, "whh": whh_pad, "bg": bg_pad,
        "wd": wd_pad, "bd": bd_pad,
        "hid": H, "num_tokens": NT,
    }


# -----------------------------------------------------------------------------
# Fused multi-step forward: T controller steps in a single pallas_call.
# -----------------------------------------------------------------------------
def controller_steps(kparams, xs, hidden, *, tanh_c):
    """xs: (T, B, num_tokens); hidden = (hx, cx) each (B, hid).
    Returns (logits (T, B, 2), (hx_T, cx_T))."""
    T, B, NT = xs.shape
    H = kparams["hid"]
    L = LANES
    hx, cx = hidden
    hx_p = jnp.zeros((B, L), jnp.float32).at[:, :H].set(hx)
    cx_p = jnp.zeros((B, L), jnp.float32).at[:, :H].set(cx)

    kernel = make_controller_kernel(tanh_c)

    def const_spec(shape):
        n = len(shape)
        return pl.BlockSpec(shape, lambda t, n=n: (0,) * n)

    grid_spec = pltpu.PrefetchScalarGridSpec(
        num_scalar_prefetch=0,
        grid=(T,),
        in_specs=[
            pl.BlockSpec((1, B, NT), lambda t: (t, 0, 0)),   # per-step inputs
            const_spec((B, L)), const_spec((B, L)),          # initial hx / cx
            const_spec((NT, L)), const_spec((1, L)),         # encoder
            const_spec((L, 4 * L)), const_spec((L, 4 * L)),  # Wih^T / Whh^T (padded)
            const_spec((1, 4 * L)),                          # fused gate bias
            const_spec((L, L)), const_spec((1, L)),          # decoder (lane-dense)
        ],
        out_specs=[
            pl.BlockSpec((1, B, L), lambda t: (t, 0, 0)),    # per-step logits
            const_spec((B, L)), const_spec((B, L)),          # final hx / cx (resident)
        ],
    )

    weight_bytes = 4 * (NT * L + L + 2 * L * 4 * L + 4 * L + L * L + L)
    cost = pl.CostEstimate(
        flops=2 * T * B * (NT * L + 2 * L * 4 * L + L * L),
        transcendentals=T * B * 6 * L,
        bytes_accessed=4 * (xs.size + 4 * B * L + T * B * L) + weight_bytes,
    )

    logits_pad, hx_out, cx_out = pl.pallas_call(
        kernel,
        out_shape=(
            jax.ShapeDtypeStruct((T, B, L), jnp.float32),
            jax.ShapeDtypeStruct((B, L), jnp.float32),
            jax.ShapeDtypeStruct((B, L), jnp.float32),
        ),
        grid_spec=grid_spec,
        # Step axis is a recurrence -> "arbitrary".
        compiler_params=pltpu.CompilerParams(dimension_semantics=("arbitrary",)),
        cost_estimate=cost,
        # TODO(synk): if hid is ever scaled beyond a few hundred, set
        # vmem_limit_bytes here (16 MiB scoped default on v5e, 64 MiB physical on
        # v7x) and/or store weights in bf16; irrelevant at hid=32.
    )(xs, hx_p, cx_p,
      kparams["we"], kparams["be"],
      kparams["wih"], kparams["whh"], kparams["bg"],
      kparams["wd"], kparams["bd"])

    # Lanes [2,128) of logits_pad hold tanh_c*sigmoid(0); slice them away here.
    return logits_pad[:, :, :2], (hx_out[:, :H], cx_out[:, :H])


def controller_forward(kparams, inputs, hidden, *, tanh_c):
    """Single forward step (module-compatible signature) via the fused kernel."""
    logits, hidden_new = controller_steps(kparams, inputs[None], hidden, tanh_c=tanh_c)
    return logits[0], hidden_new


def controller_sample(kparams, key, *, para_num, tanh_c):
    """Controller.sample(): all T forward steps run in ONE fused kernel call;
    the action draw / log-prob / entropy are vectorized JAX post-processing
    (RNG stream differs from torch.normal)."""
    H, NT = kparams["hid"], kparams["num_tokens"]
    xs = jnp.zeros((para_num, 1, NT), jnp.float32)            # static_inputs[1]
    hidden = (jnp.zeros((1, H), jnp.float32), jnp.zeros((1, H), jnp.float32))
    logits, _ = controller_steps(kparams, xs, hidden, tanh_c=tanh_c)  # (T, 1, 2)
    mean, std = logits[:, 0, 0], logits[:, 0, 1]
    actions = mean + std * jax.random.normal(key, mean.shape, jnp.float32)
    probs = jnp.exp(-(actions - mean) ** 2 / std ** 2) / std
    log_probs = jnp.log(probs)
    entropies = -(log_probs * probs)
    return actions, log_probs, entropies


# -----------------------------------------------------------------------------
# Init + pure-JAX reference (PyTorch LSTMCell semantics)
# -----------------------------------------------------------------------------
def init_params(key, num_tokens, hid):
    init_range = 0.1
    ks = jax.random.split(key, 7)
    u = lambda k, shape: jax.random.uniform(
        k, shape, jnp.float32, minval=-init_range, maxval=init_range)
    return {
        "encoder_w": u(ks[0], (hid, num_tokens)),
        "encoder_b": u(ks[1], (hid,)),
        "lstm_w_ih": u(ks[2], (4 * hid, hid)),
        "lstm_b_ih": u(ks[3], (4 * hid,)),
        "lstm_w_hh": u(ks[4], (4 * hid, hid)),
        "lstm_b_hh": u(ks[5], (4 * hid,)),
        "decoder_w": u(ks[6], (2, hid)),
        "decoder_b": jnp.zeros((2,), jnp.float32),   # .fill_(0)
    }


def reference_forward(params, inputs, hidden, *, tanh_c):
    hx, cx = hidden
    H = hx.shape[1]
    embed = inputs @ params["encoder_w"].T + params["encoder_b"]
    gates = (embed @ params["lstm_w_ih"].T + params["lstm_b_ih"]
             + hx @ params["lstm_w_hh"].T + params["lstm_b_hh"])
    i = jax.nn.sigmoid(gates[:, 0 * H:1 * H])
    f = jax.nn.sigmoid(gates[:, 1 * H:2 * H])
    g = jnp.tanh(gates[:, 2 * H:3 * H])
    o = jax.nn.sigmoid(gates[:, 3 * H:4 * H])
    cx_new = f * cx + i * g
    hx_new = o * jnp.tanh(cx_new)
    logits = hx_new @ params["decoder_w"].T + params["decoder_b"]
    return tanh_c * jax.nn.sigmoid(logits), (hx_new, cx_new)


def reference_steps(params, xs, hidden, *, tanh_c):
    logits_all = []
    for t in range(xs.shape[0]):
        logits, hidden = reference_forward(params, xs[t], hidden, tanh_c=tanh_c)
        logits_all.append(logits)
    return jnp.stack(logits_all), hidden


# -----------------------------------------------------------------------------
# Demo / correctness check
# -----------------------------------------------------------------------------
if __name__ == "__main__":
    # args.num_tokens=8, args.controller_hid=32, args.tanh_c=2.5, args.para_num=8
    num_tokens, hid, tanh_c, batch, steps = 8, 32, 2.5, 2, 8

    key = jax.random.PRNGKey(0)
    kp, kx, kh, kc, ksmp = jax.random.split(key, 5)
    params = init_params(kp, num_tokens, hid)
    xs = jax.random.normal(kx, (steps, batch, num_tokens), jnp.float32)
    hx0 = jax.random.normal(kh, (batch, hid), jnp.float32)
    cx0 = jax.random.normal(kc, (batch, hid), jnp.float32)

    kparams = prepare_params(params)   # one-time repack (hoisted out of the step)

    # ---- fused multi-step kernel vs reference loop ----
    ref_logits, (ref_hx, ref_cx) = reference_steps(params, xs, (hx0, cx0), tanh_c=tanh_c)
    logits, (hx_T, cx_T) = controller_steps(kparams, xs, (hx0, cx0), tanh_c=tanh_c)
    jax.block_until_ready((logits, hx_T, cx_T))

    assert logits.shape == (steps, batch, 2)
    assert jnp.allclose(logits, ref_logits, atol=1e-4), "multi-step logits mismatch"
    assert jnp.allclose(hx_T, ref_hx, atol=1e-4), "multi-step hx mismatch"
    assert jnp.allclose(cx_T, ref_cx, atol=1e-4), "multi-step cx mismatch"

    # ---- single-step (module-compatible forward) ----
    ref1_logits, (ref1_hx, ref1_cx) = reference_forward(
        params, xs[0], (hx0, cx0), tanh_c=tanh_c)
    l1, (h1, c1) = controller_forward(kparams, xs[0], (hx0, cx0), tanh_c=tanh_c)
    jax.block_until_ready((l1, h1, c1))

    assert l1.shape == (batch, 2)
    assert jnp.allclose(l1, ref1_logits, atol=1e-4), "single-step logits mismatch"
    assert jnp.allclose(h1, ref1_hx, atol=1e-4), "single-step hx mismatch"
    assert jnp.allclose(c1, ref1_cx, atol=1e-4), "single-step cx mismatch"

    # ---- sample(): all forward steps fused in one kernel, JAX-side sampling ----
    acts, lps, ents = controller_sample(kparams, ksmp, para_num=steps, tanh_c=tanh_c)
    jax.block_until_ready((acts, lps, ents))
    assert acts.shape == (steps,) and lps.shape == (steps,) and ents.shape == (steps,)
    assert bool(jnp.all(jnp.isfinite(acts)) & jnp.all(jnp.isfinite(lps)))

    # TODO(synk): for many independent controller chains, add a leading "parallel"
    # batch grid axis (uses v7x's second TensorCore); a single recurrent chain
    # cannot be parallelized across steps.

    print("KERNEL_OK")
</pallas_src>

<mosaic_0001>
module attributes {stable_mosaic.version = 11 : i64} {
  func.func @kernel(%arg0: i32, %arg1: memref<1x2x8xf32, #tpu.memory_space<vmem>>, %arg2: memref<2x128xf32, #tpu.memory_space<vmem>>, %arg3: memref<2x128xf32, #tpu.memory_space<vmem>>, %arg4: memref<8x128xf32, #tpu.memory_space<vmem>>, %arg5: memref<1x128xf32, #tpu.memory_space<vmem>>, %arg6: memref<128x512xf32, #tpu.memory_space<vmem>>, %arg7: memref<128x512xf32, #tpu.memory_space<vmem>>, %arg8: memref<1x512xf32, #tpu.memory_space<vmem>>, %arg9: memref<128x128xf32, #tpu.memory_space<vmem>>, %arg10: memref<1x128xf32, #tpu.memory_space<vmem>>, %arg11: memref<1x2x128xf32, #tpu.memory_space<vmem>>, %arg12: memref<2x128xf32, #tpu.memory_space<vmem>>, %arg13: memref<2x128xf32, #tpu.memory_space<vmem>>) attributes {dimension_semantics = [#tpu.dimension_semantics<arbitrary>], iteration_bounds = array<i64: 8>, scalar_prefetch = 0 : i64, scratch_operands = 0 : i64, tpu.core_type = #tpu.core_type<tc>, window_params = [{transform_indices = @transform_0, window_bounds = array<i64: 1, 2, 8>}, {pipeline_mode = #tpu.pipeline_mode<synchronous>, transform_indices = @transform_1, window_bounds = array<i64: 2, 128>}, {pipeline_mode = #tpu.pipeline_mode<synchronous>, transform_indices = @transform_2, window_bounds = array<i64: 2, 128>}, {pipeline_mode = #tpu.pipeline_mode<synchronous>, transform_indices = @transform_3, window_bounds = array<i64: 8, 128>}, {pipeline_mode = #tpu.pipeline_mode<synchronous>, transform_indices = @transform_4, window_bounds = array<i64: 1, 128>}, {pipeline_mode = #tpu.pipeline_mode<synchronous>, transform_indices = @transform_5, window_bounds = array<i64: 128, 512>}, {pipeline_mode = #tpu.pipeline_mode<synchronous>, transform_indices = @transform_6, window_bounds = array<i64: 128, 512>}, {pipeline_mode = #tpu.pipeline_mode<synchronous>, transform_indices = @transform_7, window_bounds = array<i64: 1, 512>}, {pipeline_mode = #tpu.pipeline_mode<synchronous>, transform_indices = @transform_8, window_bounds = array<i64: 128, 128>}, {pipeline_mode = #tpu.pipeline_mode<synchronous>, transform_indices = @transform_9, window_bounds = array<i64: 1, 128>}, {transform_indices = @transform_10, window_bounds = array<i64: 1, 2, 128>}, {pipeline_mode = #tpu.pipeline_mode<synchronous>, transform_indices = @transform_11, window_bounds = array<i64: 2, 128>}, {pipeline_mode = #tpu.pipeline_mode<synchronous>, transform_indices = @transform_12, window_bounds = array<i64: 2, 128>}]} {
    %c0_i32 = arith.constant 0 : i32
    %0 = arith.cmpi eq, %arg0, %c0_i32 : i32
    %1 = arith.extui %0 : i1 to i32
    %c0_i32_0 = arith.constant 0 : i32
    %2 = arith.cmpi ne, %1, %c0_i32_0 : i32
    scf.if %2 {
      %c0_36 = arith.constant 0 : index
      %c0_37 = arith.constant 0 : index
      %62 = vector.load %arg2[%c0_36, %c0_37] : memref<2x128xf32, #tpu.memory_space<vmem>>, vector<2x128xf32>
      %c0_38 = arith.constant 0 : index
      %c0_39 = arith.constant 0 : index
      %63 = vector.load %arg12[%c0_38, %c0_39] : memref<2x128xf32, #tpu.memory_space<vmem>>, vector<2x128xf32>
      tpu.vector_store %arg12[%c0_38, %c0_39], %62 {strides = array<i32>} : memref<2x128xf32, #tpu.memory_space<vmem>>, vector<2x128xf32>,
      %c0_40 = arith.constant 0 : index
      %c0_41 = arith.constant 0 : index
      %64 = vector.load %arg3[%c0_40, %c0_41] : memref<2x128xf32, #tpu.memory_space<vmem>>, vector<2x128xf32>
      %c0_42 = arith.constant 0 : index
      %c0_43 = arith.constant 0 : index
      %65 = vector.load %arg13[%c0_42, %c0_43] : memref<2x128xf32, #tpu.memory_space<vmem>>, vector<2x128xf32>
      tpu.vector_store %arg13[%c0_42, %c0_43], %64 {strides = array<i32>} : memref<2x128xf32, #tpu.memory_space<vmem>>, vector<2x128xf32>,
    } else {
    }
    %c0 = arith.constant 0 : index
    %c0_1 = arith.constant 0 : index
    %3 = vector.load %arg12[%c0, %c0_1] : memref<2x128xf32, #tpu.memory_space<vmem>>, vector<2x128xf32>
    %c0_2 = arith.constant 0 : index
    %c0_3 = arith.constant 0 : index
    %4 = vector.load %arg13[%c0_2, %c0_3] : memref<2x128xf32, #tpu.memory_space<vmem>>, vector<2x128xf32>
    %c0_4 = arith.constant 0 : index
    %c0_5 = arith.constant 0 : index
    %c0_6 = arith.constant 0 : index
    %5 = vector.load %arg1[%c0_4, %c0_5, %c0_6] : memref<1x2x8xf32, #tpu.memory_space<vmem>>, vector<1x2x8xf32>
    %6 = vector.shape_cast %5 : vector<1x2x8xf32> to vector<2x8xf32>
    %c0_7 = arith.constant 0 : index
    %c0_8 = arith.constant 0 : index
    %7 = vector.load %arg4[%c0_7, %c0_8] : memref<8x128xf32, #tpu.memory_space<vmem>>, vector<8x128xf32>
    %cst = arith.constant dense<0.000000e+00> : vector<2x128xf32>
    %8 = tpu.matmul %6, %7, %cst {dimension_numbers = #tpu.dot_dimension_numbers<[1], [0], [0], [1], [0, 0, 1, 1], [], []>} : vector<2x8xf32>, vector<8x128xf32>, vector<2x128xf32> -> vector<2x128xf32>
    %c0_9 = arith.constant 0 : index
    %c0_10 = arith.constant 0 : index
    %9 = vector.load %arg5[%c0_9, %c0_10] : memref<1x128xf32, #tpu.memory_space<vmem>>, vector<1x128xf32>
    %10 = vector.broadcast %9 : vector<1x128xf32> to vector<2x128xf32>
    %11 = arith.addf %8, %10 : vector<2x128xf32>
    %c0_11 = arith.constant 0 : index
    %c0_12 = arith.constant 0 : index
    %12 = vector.load %arg6[%c0_11, %c0_12] : memref<128x512xf32, #tpu.memory_space<vmem>>, vector<128x512xf32>
    %cst_13 = arith.constant dense<0.000000e+00> : vector<2x512xf32>
    %13 = tpu.matmul %11, %12, %cst_13 {dimension_numbers = #tpu.dot_dimension_numbers<[1], [0], [0], [1], [0, 0, 1, 1], [], []>} : vector<2x128xf32>, vector<128x512xf32>, vector<2x512xf32> -> vector<2x512xf32>
    %c0_14 = arith.constant 0 : index
    %c0_15 = arith.constant 0 : index
    %14 = vector.load %arg7[%c0_14, %c0_15] : memref<128x512xf32, #tpu.memory_space<vmem>>, vector<128x512xf32>
    %cst_16 = arith.constant dense<0.000000e+00> : vector<2x512xf32>
    %15 = tpu.matmul %3, %14, %cst_16 {dimension_numbers = #tpu.dot_dimension_numbers<[1], [0], [0], [1], [0, 0, 1, 1], [], []>} : vector<2x128xf32>, vector<128x512xf32>, vector<2x512xf32> -> vector<2x512xf32>
    %16 = arith.addf %13, %15 : vector<2x512xf32>
    %c0_17 = arith.constant 0 : index
    %c0_18 = arith.constant 0 : index
    %17 = vector.load %arg8[%c0_17, %c0_18] : memref<1x512xf32, #tpu.memory_space<vmem>>, vector<1x512xf32>
    %18 = vector.broadcast %17 : vector<1x512xf32> to vector<2x512xf32>
    %19 = arith.addf %16, %18 : vector<2x512xf32>
    %20 = vector.extract_strided_slice %19 {offsets = [0, 0], sizes = [2, 128], strides = [1, 1]} : vector<2x512xf32> to vector<2x128xf32>
    %21 = arith.negf %20 : vector<2x128xf32>
    %22 = math.exp %21 : vector<2x128xf32>
    %cst_19 = arith.constant 1.000000e+00 : f32
    %23 = vector.broadcast %cst_19 : f32 to vector<2x128xf32>
    %24 = arith.addf %23, %22 : vector<2x128xf32>
    %25 = arith.divf %23, %24 : vector<2x128xf32>
    %26 = vector.extract_strided_slice %19 {offsets = [0, 128], sizes = [2, 128], strides = [1, 1]} : vector<2x512xf32> to vector<2x128xf32>
    %27 = arith.negf %26 : vector<2x128xf32>
    %28 = math.exp %27 : vector<2x128xf32>
    %cst_20 = arith.constant 1.000000e+00 : f32
    %29 = vector.broadcast %cst_20 : f32 to vector<2x128xf32>
    %30 = arith.addf %29, %28 : vector<2x128xf32>
    %31 = arith.divf %29, %30 : vector<2x128xf32>
    %32 = vector.extract_strided_slice %19 {offsets = [0, 256], sizes = [2, 128], strides = [1, 1]} : vector<2x512xf32> to vector<2x128xf32>
    %33 = math.tanh %32 : vector<2x128xf32>
    %34 = vector.extract_strided_slice %19 {offsets = [0, 384], sizes = [2, 128], strides = [1, 1]} : vector<2x512xf32> to vector<2x128xf32>
    %35 = arith.negf %34 : vector<2x128xf32>
    %36 = math.exp %35 : vector<2x128xf32>
    %cst_21 = arith.constant 1.000000e+00 : f32
    %37 = vector.broadcast %cst_21 : f32 to vector<2x128xf32>
    %38 = arith.addf %37, %36 : vector<2x128xf32>
    %39 = arith.divf %37, %38 : vector<2x128xf32>
    %40 = arith.mulf %31, %4 : vector<2x128xf32>
    %41 = arith.mulf %25, %33 : vector<2x128xf32>
    %42 = arith.addf %40, %41 : vector<2x128xf32>
    %43 = math.tanh %42 : vector<2x128xf32>
    %44 = arith.mulf %39, %43 : vector<2x128xf32>
    %c0_22 = arith.constant 0 : index
    %c0_23 = arith.constant 0 : index
    %45 = vector.load %arg9[%c0_22, %c0_23] : memref<128x128xf32, #tpu.memory_space<vmem>>, vector<128x128xf32>
    %cst_24 = arith.constant dense<0.000000e+00> : vector<2x128xf32>
    %46 = tpu.matmul %44, %45, %cst_24 {dimension_numbers = #tpu.dot_dimension_numbers<[1], [0], [0], [1], [0, 0, 1, 1], [], []>} : vector<2x128xf32>, vector<128x128xf32>, vector<2x128xf32> -> vector<2x128xf32>
    %c0_25 = arith.constant 0 : index
    %c0_26 = arith.constant 0 : index
    %47 = vector.load %arg10[%c0_25, %c0_26] : memref<1x128xf32, #tpu.memory_space<vmem>>, vector<1x128xf32>
    %48 = vector.broadcast %47 : vector<1x128xf32> to vector<2x128xf32>
    %49 = arith.addf %46, %48 : vector<2x128xf32>
    %50 = arith.negf %49 : vector<2x128xf32>
    %51 = math.exp %50 : vector<2x128xf32>
    %cst_27 = arith.constant 1.000000e+00 : f32
    %52 = vector.broadcast %cst_27 : f32 to vector<2x128xf32>
    %53 = arith.addf %52, %51 : vector<2x128xf32>
    %54 = arith.divf %52, %53 : vector<2x128xf32>
    %cst_28 = arith.constant 2.500000e+00 : f32
    %55 = vector.broadcast %cst_28 : f32 to vector<2x128xf32>
    %56 = arith.mulf %55, %54 : vector<2x128xf32>
    %c0_29 = arith.constant 0 : index
    %c0_30 = arith.constant 0 : index
    %c0_31 = arith.constant 0 : index
    %57 = vector.load %arg11[%c0_29, %c0_30, %c0_31] : memref<1x2x128xf32, #tpu.memory_space<vmem>>, vector<1x2x128xf32>
    %58 = vector.shape_cast %57 : vector<1x2x128xf32> to vector<2x128xf32>
    %59 = vector.shape_cast %56 : vector<2x128xf32> to vector<1x2x128xf32>
    tpu.vector_store %arg11[%c0_29, %c0_30, %c0_31], %59 {strides = array<i32>} : memref<1x2x128xf32, #tpu.memory_space<vmem>>, vector<1x2x128xf32>,
    %c0_32 = arith.constant 0 : index
    %c0_33 = arith.constant 0 : index
    %60 = vector.load %arg12[%c0_32, %c0_33] : memref<2x128xf32, #tpu.memory_space<vmem>>, vector<2x128xf32>
    tpu.vector_store %arg12[%c0_32, %c0_33], %44 {strides = array<i32>} : memref<2x128xf32, #tpu.memory_space<vmem>>, vector<2x128xf32>,
    %c0_34 = arith.constant 0 : index
    %c0_35 = arith.constant 0 : index
    %61 = vector.load %arg13[%c0_34, %c0_35] : memref<2x128xf32, #tpu.memory_space<vmem>>, vector<2x128xf32>
    tpu.vector_store %arg13[%c0_34, %c0_35], %42 {strides = array<i32>} : memref<2x128xf32, #tpu.memory_space<vmem>>, vector<2x128xf32>,
    return
  }
  func.func @transform_0(%arg0: i32) -> (i32, i32, i32) {
    %c0_i32 = arith.constant 0 : i32
    %c0_i32_0 = arith.constant 0 : i32
    %c0_i32_1 = arith.constant 0 : i32
    return %arg0, %c0_i32, %c0_i32_0 : i32, i32, i32
  }
  func.func @transform_1(%arg0: i32) -> (i32, i32) {
    %c0_i32 = arith.constant 0 : i32
    %c0_i32_0 = arith.constant 0 : i32
    %c0_i32_1 = arith.constant 0 : i32
    return %c0_i32, %c0_i32_0 : i32, i32
  }
  func.func @transform_2(%arg0: i32) -> (i32, i32) {
    %c0_i32 = arith.constant 0 : i32
    %c0_i32_0 = arith.constant 0 : i32
    %c0_i32_1 = arith.constant 0 : i32
    return %c0_i32, %c0_i32_0 : i32, i32
  }
  func.func @transform_3(%arg0: i32) -> (i32, i32) {
    %c0_i32 = arith.constant 0 : i32
    %c0_i32_0 = arith.constant 0 : i32
    %c0_i32_1 = arith.constant 0 : i32
    return %c0_i32, %c0_i32_0 : i32, i32
  }
  func.func @transform_4(%arg0: i32) -> (i32, i32) {
    %c0_i32 = arith.constant 0 : i32
    %c0_i32_0 = arith.constant 0 : i32
    %c0_i32_1 = arith.constant 0 : i32
    return %c0_i32, %c0_i32_0 : i32, i32
  }
  func.func @transform_5(%arg0: i32) -> (i32, i32) {
    %c0_i32 = arith.constant 0 : i32
    %c0_i32_0 = arith.constant 0 : i32
    %c0_i32_1 = arith.constant 0 : i32
    return %c0_i32, %c0_i32_0 : i32, i32
  }
  func.func @transform_6(%arg0: i32) -> (i32, i32) {
    %c0_i32 = arith.constant 0 : i32
    %c0_i32_0 = arith.constant 0 : i32
    %c0_i32_1 = arith.constant 0 : i32
    return %c0_i32, %c0_i32_0 : i32, i32
  }
  func.func @transform_7(%arg0: i32) -> (i32, i32) {
    %c0_i32 = arith.constant 0 : i32
    %c0_i32_0 = arith.constant 0 : i32
    %c0_i32_1 = arith.constant 0 : i32
    return %c0_i32, %c0_i32_0 : i32, i32
  }
  func.func @transform_8(%arg0: i32) -> (i32, i32) {
    %c0_i32 = arith.constant 0 : i32
    %c0_i32_0 = arith.constant 0 : i32
    %c0_i32_1 = arith.constant 0 : i32
    return %c0_i32, %c0_i32_0 : i32, i32
  }
  func.func @transform_9(%arg0: i32) -> (i32, i32) {
    %c0_i32 = arith.constant 0 : i32
    %c0_i32_0 = arith.constant 0 : i32
    %c0_i32_1 = arith.constant 0 : i32
    return %c0_i32, %c0_i32_0 : i32, i32
  }
  func.func @transform_10(%arg0: i32) -> (i32, i32, i32) {
    %c0_i32 = arith.constant 0 : i32
    %c0_i32_0 = arith.constant 0 : i32
    %c0_i32_1 = arith.constant 0 : i32
    return %arg0, %c0_i32, %c0_i32_0 : i32, i32, i32
  }
  func.func @transform_11(%arg0: i32) -> (i32, i32) {
    %c0_i32 = arith.constant 0 : i32
    %c0_i32_0 = arith.constant 0 : i32
    %c0_i32_1 = arith.constant 0 : i32
    return %c0_i32, %c0_i32_0 : i32, i32
  }
  func.func @transform_12(%arg0: i32) -> (i32, i32) {
    %c0_i32 = arith.constant 0 : i32
    %c0_i32_0 = arith.constant 0 : i32
    %c0_i32_1 = arith.constant 0 : i32
    return %c0_i32, %c0_i32_0 : i32, i32
  }
}

</mosaic_0001>

<bundles_post_ra>
// kernel: tpu_custom_call.1
= control target key start
LH: loop header
LB: loop body
LE: loop exit
PB: predicated region body
PF: predicated region fallthrough
CT: control target
= control target key end

     0   :  { %s2377_s0 = inlined_call_operand.hbm [shape: f32[8,2,8], index: 0, kind: input, shape index: {}]   ;;  %s2378_s1 = inlined_call_operand.vmem [shape: f32[2,128], index: 1, kind: input, shape index: {}]   ;;  %s2379_s2 = inlined_call_operand.hbm [shape: f32[2,128], index: 2, kind: input, shape index: {}]   ;;  %s2380_s3 = inlined_call_operand.vmem [shape: f32[8,128], index: 3, kind: input, shape index: {}]   ;;  %s2381_s4 = inlined_call_operand.vmem [shape: f32[1,128], index: 4, kind: input, shape index: {}]   ;;  %s2382_s5 = inlined_call_operand.hbm [shape: f32[128,512], index: 5, kind: input, shape index: {}]   ;;  %s2383_s6 = inlined_call_operand.hbm [shape: f32[128,512], index: 6, kind: input, shape index: {}]   ;;  %s2384_s7 = inlined_call_operand.vmem [shape: f32[1,512], index: 7, kind: input, shape index: {}]   ;;  %s2385_s8 = inlined_call_operand.hbm [shape: f32[128,128], index: 8, kind: input, shape index: {}]   ;;  %s2386_s9 = inlined_call_operand.vmem [shape: f32[1,128], index: 9, kind: input, shape index: {}]   ;;  %s2387_s10 = inlined_call_operand.hbm [shape: f32[8,2,128], index: 10, kind: output, shape index: {0}]   ;;  %s2388_s11 = inlined_call_operand.hbm [shape: f32[2,128], index: 11, kind: output, shape index: {1}]   ;;  %s2389_s12 = inlined_call_operand.hbm [shape: f32[2,128], index: 12, kind: output, shape index: {2}]  }
   0x1   :  { %2395 = sst [smem:[#allocation20_spill]] %s2379_s2 }
   0x2   :  { %2396 = sst [smem:[#allocation21_spill]] %s2382_s5 }
   0x3   :  { %2397 = sst [smem:[#allocation22_spill]] %s2383_s6 }
   0x4   :  { %2398 = sst [smem:[#allocation23_spill]] %s2386_s9 }
   0x5   :  { %2399 = sst [smem:[#allocation24_spill]] %s2387_s10 }
   0x6   :  { %18 = vsyncpa [#allocation3], 0 }
   0x7   :  { %20 = vsyncpa [#allocation3 + $0x1], 0 }
   0x8   :  { %21 = vsyncpa [#allocation6], 0 }
   0x9   :  { %22 = vsyncpa [#allocation9], 0 }
   0xa   :  { %23 = vsyncpa [#allocation4], 0 }
   0xb   :  { %25 = vsyncpa [#allocation4 + $0x1], 0 }
   0xc   :  { %26 = vsyncpa [#allocation13], 0  ;;  %s2033_s21 = smov 0   ;;  %s2035_s22 = smov 0  }
   0xd   :  { %s2037_s23 = smov 0   ;;  %s2039_s24 = smov 0  }
   0xe LB: > { %s1953_s25 = smov [#allocation5]   ;;  %s2054_s27 = sadd.s32 4294967295, %s1951_s24   ;;  %s1951_s24 = sphi %s2039_s24, %s2433_s24   ;;  %s1947_s23 = sphi %s2037_s23, %s2432_s23   ;;  %s1943_s22 = sphi %s2035_s22, %s2431_s22   ;;  %s1939_s21 = sphi %s2033_s21, %s2430_s21  }
   0xf   : > { %s336_s26 = sshll.u32 %s1953_s25, 4  ;;  %p1305_p0 = scmp.ge.s32.totalorder %s1951_s24, 1  ;;  %s337_s26 = int_to_ptr.vmem [resolvable:$true] %s336_s26 }
  0x10   : > { %p2390_p1 = scmp.eq.s32.totalorder %s2054_s27, 0  ;;  %p320_p2 = scmp.lt.s32.totalorder %s1951_s24, 9 }
  0x11   : > { %s1954_s29 = smov [#allocation8]   ;;  %s1955_s14 = smov [#allocation7]  }
  0x12   : > { %p2060_p4 = pnand %p1305_p0, %p320_p2  ;;  %s365_s30 = sshll.u32 %s1954_s29, 4  ;;  %s2072_s30 = int_to_ptr.vmem [resolvable:$true] %s365_s30 }
  0x13   : > { %s352_s15 = sshll.u32 %s1955_s14, 4  ;;  %s2402_s2 = sld [smem:[#allocation20_spill]]  ;;  %s2074_s15 = int_to_ptr.vmem [resolvable:$true] %s352_s15 }
  0x14   : > { %s2400_s28 = scalar_select %p2060_p4, 1, 0 }
  0x15   : > { %p1579_p5 = pneg %p2060_p4 }
  0x17   : > { %p2068_p6 = pnand %p1579_p5, %p2390_p1 }
  0x19   : > { %s1679_s18 = scalar_lea.hbm %s2402_s2, 32  ;;  %p2084_p8 = pneg %p2068_p6 }
  0x1a   : > { %p1680_p7 = scmp.ne.s32.totalorder %s2402_s2, %s1679_s18  ;;  %p1686_p11 = scmp.lt.u32.totalorder %s1679_s18, %s2402_s2 }
  0x1c   : > { %p1682_p9 = pnand %p2084_p8, %p1680_p7 }
  0x1e   : > { %p1683_p10 = pneg %p1682_p9 }
  0x20   : > { %p1688_p12 = pnand %p1686_p11, %p1683_p10 }
  0x22   : > { %1691 = shalt.err (!%p1688_p12)
}
  0x23   : > { %s1692_s16 = scalar_lea.vmem %s337_s26, 32  ;;  %p1700_p5 = scmp.lt.s32.totalorder %s337_s26, %s337_s26 }
  0x24   : > { %p1693_p13 = scmp.ne.s32.totalorder %s337_s26, %s1692_s16  ;;  %p1701_p3 = scmp.lt.s32.totalorder %s1692_s16, %s1692_s16 }
  0x26   : > { %p1695_p0 = pnand %p1693_p13, %p2084_p8  ;;  %p1702_p1 = por %p1701_p3, %p1700_p5 }
  0x28   : > { %p1696_p2 = pneg %p1695_p0 }
  0x2a   : > { %p1703_p4 = pnand %p1702_p1, %p1696_p2 }
  0x2c   : > { %1706 = shalt.err (!%p1703_p4)
}
  0x2d   : > { %1582 = dma.hbm_to_vmem [thread:$0]  (!%p2068_p6), %s2402_s2, 32, %s337_s26, [#allocation6]  }
  0x2e   : > { %s2404_s6 = sld [smem:[#allocation22_spill]] }
  0x34   : > { %s1707_s29 = scalar_lea.hbm %s2404_s6, 8192 }
  0x35   : > { %p1708_p7 = scmp.ne.s32.totalorder %s2404_s6, %s1707_s29  ;;  %p1714_p1 = scmp.lt.u32.totalorder %s1707_s29, %s2404_s6 }
  0x37   : > { %p1710_p9 = pnand %p1708_p7, %p2084_p8 }
  0x39   : > { %p1711_p3 = pneg %p1710_p9 }
  0x3b   : > { %p1716_p4 = pnand %p1714_p1, %p1711_p3 }
  0x3d   : > { %1719 = shalt.err (!%p1716_p4)
}
  0x3e   : > { %s1720_s26 = scalar_lea.vmem %s2072_s30, 8192  ;;  %p1728_p13 = scmp.lt.s32.totalorder %s2072_s30, %s2072_s30 }
  0x3f   : > { %p1721_p10 = scmp.ne.s32.totalorder %s2072_s30, %s1720_s26  ;;  %p1729_p0 = scmp.lt.s32.totalorder %s1720_s26, %s1720_s26 }
  0x41   : > { %p1723_p11 = pnand %p1721_p10, %p2084_p8  ;;  %p1730_p2 = por %p1729_p0, %p1728_p13 }
  0x43   : > { %p1724_p12 = pneg %p1723_p11 }
  0x45   : > { %p1731_p5 = pnand %p1730_p2, %p1724_p12 }
  0x47   : > { %1734 = shalt.err (!%p1731_p5)
}
  0x48   : > { %s1956_s10 = smov 512   ;;  %s1957_s9 = smov 32  }
  0x49   : > { %1588 = dma.hbm_to_vmem [thread:$0]  (!%p2068_p6), %s2404_s6, 8192, %s2072_s30, [#allocation9], %s1956_s10, %s1956_s10, %s1957_s9  }
  0x4a   : > { %s2405_s5 = sld [smem:[#allocation21_spill]] }
  0x50   : > { %s1735_s29 = scalar_lea.hbm %s2405_s5, 8192 }
  0x51   : > { %p1736_p7 = scmp.ne.s32.totalorder %s2405_s5, %s1735_s29  ;;  %p1742_p1 = scmp.lt.u32.totalorder %s1735_s29, %s2405_s5 }
  0x53   : > { %p1738_p9 = pnand %p1736_p7, %p2084_p8 }
  0x55   : > { %p1739_p3 = pneg %p1738_p9 }
  0x57   : > { %p1744_p4 = pnand %p1742_p1, %p1739_p3 }
  0x59   : > { %1747 = shalt.err (!%p1744_p4)
}
  0x5a   : > { %s1748_s30 = scalar_lea.vmem %s2074_s15, 8192  ;;  %p1756_p13 = scmp.lt.s32.totalorder %s2074_s15, %s2074_s15 }
  0x5b   : > { %p1749_p10 = scmp.ne.s32.totalorder %s2074_s15, %s1748_s30  ;;  %p1757_p0 = scmp.lt.s32.totalorder %s1748_s30, %s1748_s30 }
  0x5d   : > { %p1751_p11 = pnand %p1749_p10, %p2084_p8  ;;  %p1758_p2 = por %p1757_p0, %p1756_p13 }
  0x5f   : > { %p1752_p12 = pneg %p1751_p11 }
  0x61   : > { %p1759_p5 = pnand %p1758_p2, %p1752_p12 }
  0x63   : > { %1762 = shalt.err (!%p1759_p5)
}
  0x64   : > { %1585 = dma.hbm_to_vmem [thread:$0]  (!%p2068_p6), %s2405_s5, 8192, %s2074_s15, [#allocation6], %s1956_s10, %s1956_s10, %s1957_s9  }
  0x65   : > { %s1958_s19 = smov [#allocation10]   ;;  %s1763_s14 = scalar_lea.hbm %s2385_s8, 2048 }
  0x66   : > { %s381_s18 = sshll.u32 %s1958_s19, 4  ;;  %p1764_p7 = scmp.ne.s32.totalorder %s2385_s8, %s1763_s14  ;;  %s382_s18 = int_to_ptr.vmem [resolvable:$true] %s381_s18 }
  0x67   : > { %p1770_p1 = scmp.lt.u32.totalorder %s1763_s14, %s2385_s8 }
  0x68   : > { %p1766_p9 = pnand %p1764_p7, %p2084_p8 }
  0x6a   : > { %p1767_p3 = pneg %p1766_p9 }
  0x6c   : > { %p1772_p4 = pnand %p1770_p1, %p1767_p3 }
  0x6e   : > { %1775 = shalt.err (!%p1772_p4)
}
  0x6f   : > { %s1776_s15 = scalar_lea.vmem %s382_s18, 2048  ;;  %p1784_p13 = scmp.lt.s32.totalorder %s382_s18, %s382_s18 }
  0x70   : > { %p1777_p10 = scmp.ne.s32.totalorder %s382_s18, %s1776_s15  ;;  %p1785_p0 = scmp.lt.s32.totalorder %s1776_s15, %s1776_s15 }
  0x72   : > { %p1779_p11 = pnand %p1777_p10, %p2084_p8  ;;  %p1786_p2 = por %p1785_p0, %p1784_p13 }
  0x74   : > { %p1780_p12 = pneg %p1779_p11 }
  0x76   : > { %p1787_p5 = pnand %p1786_p2, %p1780_p12 }
  0x78   : > { %1790 = shalt.err (!%p1787_p5)
}
  0x79   : > { %s1959_s10 = smov 128   ;;  %s1960_s6 = smov 8  }
  0x7a   : > { %1591 = dma.hbm_to_vmem [thread:$0]  (!%p2068_p6), %s2385_s8, 2048, %s382_s18, [#allocation9], %s1959_s10, %s1959_s10, %s1960_s6  }
  0x7b   : > { %s1304_s2 = sadd.s32 4294967294, %s1951_s24   ;;  %s2166_s17 = sadd.s32 1, %s1951_s24  }
  0x7c   : > { %s36_s19 = ssub.s32 %s1951_s24, %s2166_s17  ;;  %s39_s20 = sadd.s32 1, %s1947_s23 }
  0x7d   : > { %p37_p8 = scmp.eq.s32.totalorder %s36_s19, 0  ;;  %p46_p7 = scmp.ne.s32.totalorder %s1947_s23, %s1943_s22 }
  0x7e   : > { %p47_p9 = scmp.eq.s32.totalorder %s1951_s24, 0  ;;  %p52_p3 = scmp.ne.s32.totalorder %s1943_s22, %s1939_s21 }
  0x7f   : > { %s2177_s29 = scalar_select %p37_p8, %s1947_s23, %s39_s20  }
  0x80   : > { %p2179_p1 = por %p47_p9, %p46_p7  ;;  %p2407_p4 = scmp.eq.s32.totalorder %s2054_s27, 0 }
  0x81   : > { %p2393_p10 = scmp.eq.s32.totalorder %s2054_s27, 7  ;;  %p271_p11 = scmp.eq.s32.totalorder %s1304_s2, 7 }
  0x82   : > { %p2185_p6 = por %p2407_p4, %p52_p3  ;;  %p1604_p12 = scmp.lt.s32.totalorder %s1951_s24, 8 }
  0x83   : > { %s398_s14 = sand.u32 1, %s1947_s23   ;;  %p2194_p13 = por %p2393_p10, %p46_p7 }
  0x84   : > { %p2198_p0 = por %p271_p11, %p52_p3  ;;  %s1311_s30 = sshll.u32 %s398_s14, 1 }
  0x85   : > { %s2409_s16 = scalar_select %p2194_p13, 1, 0 }
  0x86   : > { %s2410_s26 = scalar_select %p2198_p0, 1, 0 }
  0x87   : > { %s1312_s15 = sshll.u32 %s1951_s24, 5  ;;  %s402_s9 = scalar_lea.vmem [#allocation2], %s1311_s30 }
  0x88   : > { %s2206_s25 = scalar_lea.hbm %s2377_s0, %s1312_s15  ;;  %s409_s2 = sshll.u32 %s402_s9, 4  ;;  %s2208_s2 = int_to_ptr.vmem [resolvable:$true] %s409_s2 }
  0x89   : > { %p2212_p2 = pnand %p1604_p12, %p2179_p1  ;;  %s399_s20 = scalar_lea.sflag [#allocation3], %s398_s14 }
  0x8a   : > { %s1791_s5 = scalar_lea.hbm %s2206_s25, 32  ;;  %s1796_s10 = scalar_lea.hbm %s2377_s0, 256 }
  0x8b   : > { %p1792_p5 = scmp.ne.s32.totalorder %s2206_s25, %s1791_s5  ;;  %p1793_p8 = pneg %p2212_p2 }
  0x8c   : > { %p1797_p3 = scmp.lt.u32.totalorder %s2206_s25, %s2377_s0  ;;  %p1798_p1 = scmp.lt.u32.totalorder %s1796_s10, %s1791_s5 }
  0x8d   : > { %p1794_p7 = pnand %p1793_p8, %p1792_p5  ;;  %p1800_p11 = scmp.lt.u32.totalorder %s1791_s5, %s2206_s25 }
  0x8e   : > { %p1799_p4 = por %p1798_p1, %p1797_p3 }
  0x8f   : > { %p1795_p9 = pneg %p1794_p7 }
  0x90   : > { %p1801_p12 = por %p1800_p11, %p1799_p4 }
  0x92   : > { %p1802_p10 = pnand %p1801_p12, %p1795_p9 }
  0x94   : > { %1805 = shalt.err (!%p1802_p10)
}
  0x95   : > { %s1806_s14 = scalar_lea.vmem %s2208_s2, 32  ;;  %s1961_s9 = smov [#allocation2]  }
  0x96   : > { %p1807_p5 = scmp.ne.s32.totalorder %s2208_s2, %s1806_s14  ;;  %s1811_s30 = sshll.u32 %s1961_s9, 4  ;;  %s1812_s30 = int_to_ptr.vmem [resolvable:$false] %s1811_s30 }
  0x97   : > { %s1813_s15 = scalar_lea.vmem %s1812_s30, 64  ;;  %p1814_p13 = scmp.lt.s32.totalorder %s2208_s2, %s1812_s30 }
  0x98   : > { %p1809_p7 = pnand %p1807_p5, %p1793_p8  ;;  %p1815_p3 = scmp.lt.s32.totalorder %s1813_s15, %s1806_s14 }
  0x9a   : > { %p1810_p0 = pneg %p1809_p7  ;;  %p1816_p1 = por %p1815_p3, %p1814_p13 }
  0x9c   : > { %p1817_p4 = pnand %p1816_p1, %p1810_p0 }
  0x9e   : > { %1820 = shalt.err (!%p1817_p4)
}
  0x9f   : > { %1595 = dma.hbm_to_vmem [thread:$0]  (!%p2212_p2), %s2206_s25, 32, %s2208_s2, %s399_s20  }
  0xa0   : > { %p2412_p10 = scmp.ne.s32.totalorder %s2400_s28, 0 }
  0xa1   : > { %s2244_s5 = sand.u32 (!%p2412_p10), 1, %s1943_s22  }
  0xa2   : > { %418 = sbr.rel (%p2412_p10) target bundleno = 922 (0x39a), region = 60  ;;  %s1314_s10 = sshll.u32 (!%p2412_p10), %s2244_s5, 1 }
  0xa3   : > { %s421_s13 = scalar_lea.sflag (!%p2412_p10), [#allocation3], %s2244_s5  ;;  %s424_s6 = scalar_lea.vmem (!%p2412_p10), [#allocation2], %s1314_s10 }
  0xa9   : > { %1918 = dma.done.wait (%p2185_p6), %s421_s13, 32  }
  0xaa   : > { %1920 = vsyncadd (%p2185_p6), %s421_s13, 4294967264  ;;  %p2413_p13 = scmp.eq.s32.totalorder %s2054_s27, 0 }
  0xac   : > { %1922 = dma.done.wait (%p2413_p13), [#allocation6], 8224   ;;  %p2414_p0 = pmov %p2413_p13 }
  0xae   : > { %1924 = vsyncadd (%p2414_p0), [#allocation6], 4294959072  ;;  %p2415_p2 = pmov %p2414_p0 }
  0xaf   : > { %p2416_p8 = pmov %p2414_p0 }
  0xb0   : > { %1926 = dma.done.wait (%p2415_p2), [#allocation9], 10240  }
  0xb1   : > { %1928 = vsyncadd (%p2416_p8), [#allocation9], 4294957056  ;;  %s2260_s28 = scalar_lea.vmem [#allocation11], %s1314_s10  ;;  %p2417_p9 = scmp.ne.s32.totalorder %s2054_s27, 0 }
  0xb2   : > { %v485_v0 = vld [vmem:[%s2378_s1] sm:$0x3] (!%p2417_p9)  ;;  %v487_v1 = vld [vmem:[#allocation5] sm:$0x3] (!%p2417_p9) }
  0xb3   : > { %484 = sbr.rel (%p2417_p9) target bundleno = 186 (0xba), region = 84  ;;  %486 = vst [vmem:[#allocation12] sm:$0x3] (!%p2417_p9), %v485_v0  ;;  %488 = vst [vmem:[#allocation14] sm:$0x3] (!%p2417_p9), %v487_v1 }
  0xba PF: > { %v492_v2 = vld [vmem:[%s2380_s3] sm:$0xff]  ;;  %vm500_vm0 = vcmask 64512   ;;  %v1962_v4 = vmov 0.0   ;;  %vm1963_vm1 = vmmov 0   ;;  %v639_v5 = vld [vmem:[#allocation8 + $0x8] sm:$0xff]  ;;  %v640_v14 = vld [vmem:[#allocation8 + $0x10] sm:$0xff] }
  0xbb   : > { %v491_v3 = vld [vmem:[%s424_s6] sm:$0x3]  ;;  %1355 = vmatprep.subr.mxu0 %v1962_v4  ;;  %1357 = vmatprep.mubr.msk.f32.mxu0 %vm1963_vm1, %v1962_v4  ;;  %v643_v6 = vld [vmem:[#allocation8 + $0x28] sm:$0xff]  ;;  %v638_v10 = vld [vmem:[#allocation8] sm:$0xff]  ;;  %s1965_s15 = smov [#allocation12]   ;;  %p2418_p11 = scmp.eq.s32.totalorder %s2054_s27, 7 }
  0xbc   : > { %v641_v7 = vld [vmem:[#allocation8 + $0x18] sm:$0xff]  ;;  %1356 = vmatpush3.msra.mxu0 %v492_v2  ;;  %v1395_v8 = vpack.c.bf16 %v643_v6, %v639_v5  ;;  %v642_v11 = vld [vmem:[#allocation8 + $0x20] sm:$0xff]  ;;  %766 = vmatprep.mubr.f32.mxu1 %v1962_v4  ;;  %v644_v15 = vld [vmem:[#allocation8 + $0x30] sm:$0xff]  ;;  %s1164_s10 = sshll.u32 %s1965_s15, 4  ;;  %s1165_s10 = int_to_ptr.vmem [resolvable:$true] %s1164_s10 }
  0xbd   : > { %v645_v9 = vld [vmem:[#allocation8 + $0x38] sm:$0xff]  ;;  %1358 = vmatmul.mubr.msk.f32.vlgmr.msra.gmra.mrb[0].mxu0 %vm500_vm0, %v491_v3  ;;  %v1397_v13 = vpack.c.bf16 %v642_v11, %v638_v10  ;;  %v647_v16 = vld [vmem:[#allocation8 + $0x48] sm:$0xff]  ;;  %v1429_v17 = vpack.c.bf16 %v644_v15, %v640_v14  ;;  %v646_v23 = vld [vmem:[#allocation8 + $0x40] sm:$0xff]  ;;  %s1821_s13 = scalar_lea.vmem %s1165_s10, 32  ;;  %p1828_p7 = scmp.lt.s32.totalorder %s1165_s10, %s1165_s10 }
  0xbe   : > { %v1427_v12 = vpack.c.bf16 %v645_v9, %v641_v7  ;;  %1396 = vmatprep.subr.bf16.mxu1 %v1395_v8  ;;  %v651_v18 = vld [vmem:[#allocation8 + $0x68] sm:$0xff]  ;;  %v649_v19 = vld [vmem:[#allocation8 + $0x58] sm:$0xff]  ;;  %837 = vmatprep.mubr.f32.mxu0 %v1962_v4  ;;  %v650_v24 = vld [vmem:[#allocation8 + $0x60] sm:$0xff]  ;;  %p1822_p6 = scmp.ne.s32.totalorder %s1165_s10, %s1821_s13  ;;  %p1829_p3 = scmp.lt.s32.totalorder %s1821_s13, %s1821_s13 }
  0xbf   : > { %v653_v20 = vld [vmem:[#allocation8 + $0x78] sm:$0xff]  ;;  %1398 = vmatpush1.bf16.msra.mxu1 %v1397_v13  ;;  %v1399_v21 = vpack.c.bf16 %v651_v18, %v647_v16  ;;  %v648_v25 = vld [vmem:[#allocation8 + $0x50] sm:$0xff]  ;;  %v1401_v26 = vpack.c.bf16 %v650_v24, %v646_v23  ;;  %v655_v28 = vld [vmem:[#allocation8 + $0x88] sm:$0xff] }
  0xc0   : > { %1428 = vmatprep.subr.bf16.mxu0 %v1427_v12  ;;  %v1431_v22 = vpack.c.bf16 %v653_v20, %v649_v19  ;;  %v652_v27 = vld [vmem:[#allocation8 + $0x70] sm:$0xff]  ;;  %v659_v29 = vld [vmem:[#allocation8 + $0xa8] sm:$0xff]  ;;  %v657_v32 = vld [vmem:[#allocation8 + $0x98] sm:$0xff]  ;;  %p1823_p12 = pnand %p1822_p6, %p2418_p11  ;;  %p1830_p1 = por %p1829_p3, %p1828_p7 }
  0xc1   : > { %1430 = vmatpush1.bf16.msra.mxu0 %v1429_v17  ;;  %1400 = vmatprep.subr.bf16.mxu1 %v1399_v21  ;;  %v1433_v30 = vpack.c.bf16 %v652_v27, %v648_v25  ;;  %v1403_v31 = vpack.c.bf16 %v659_v29, %v655_v28  ;;  %v661_v33 = vld [vmem:[#allocation8 + $0xb8] sm:$0xff]  ;;  %v654_v34 = vld [vmem:[#allocation8 + $0x80] sm:$0xff]  ;;  %v656_v37 = vld [vmem:[#allocation8 + $0x90] sm:$0xff] }
  0xc2   : > { %1432 = vmatprep.subr.bf16.mxu0 %v1431_v22  ;;  %v1435_v35 = vpack.c.bf16 %v661_v33, %v657_v32  ;;  %v658_v36 = vld [vmem:[#allocation8 + $0xa0] sm:$0xff]  ;;  %v660_v38 = vld [vmem:[#allocation8 + $0xb0] sm:$0xff]  ;;  %v663_v40 = vld [vmem:[#allocation8 + $0xc8] sm:$0xff]  ;;  %p1824_p5 = pneg %p1823_p12 }
  0xc3   : > { %1402 = vmatpush1.bf16.msra.mxu1 %v1401_v26  ;;  %v1405_v39 = vpack.c.bf16 %v658_v36, %v654_v34  ;;  %v667_v41 = vld [vmem:[#allocation8 + $0xe8] sm:$0xff]  ;;  %v665_v42 = vld [vmem:[#allocation8 + $0xd8] sm:$0xff]  ;;  %v1437_v43 = vpack.c.bf16 %v660_v38, %v656_v37  ;;  %v662_v46 = vld [vmem:[#allocation8 + $0xc0] sm:$0xff] }
  0xc4   : > { %1404 = vmatprep.subr.bf16.mxu1 %v1403_v31  ;;  %v1407_v44 = vpack.c.bf16 %v667_v41, %v663_v40  ;;  %v669_v45 = vld [vmem:[#allocation8 + $0xf8] sm:$0xff]  ;;  %v666_v47 = vld [vmem:[#allocation8 + $0xe0] sm:$0xff]  ;;  %v664_v49 = vld [vmem:[#allocation8 + $0xd0] sm:$0xff]  ;;  %p1831_p4 = pnand %p1830_p1, %p1824_p5 }
  0xc5   : > { %1434 = vmatpush1.bf16.msra.mxu0 %v1433_v30  ;;  %v1439_v48 = vpack.c.bf16 %v669_v45, %v665_v42  ;;  %v668_v50 = vld [vmem:[#allocation8 + $0xf0] sm:$0xff]  ;;  %v671_v51 = vld [vmem:[#allocation8 + $0x108] sm:$0xff]  ;;  %v673_v53 = vld [vmem:[#allocation8 + $0x118] sm:$0xff]  ;;  %v1409_v55 = vpack.c.bf16 %v666_v47, %v662_v46 }
  0xc6   : > { %1436 = vmatprep.subr.bf16.mxu0 %v1435_v35  ;;  %v675_v52 = vld [vmem:[#allocation8 + $0x128] sm:$0xff]  ;;  %v677_v54 = vld [vmem:[#allocation8 + $0x138] sm:$0xff]  ;;  %v1441_v56 = vpack.c.bf16 %v668_v50, %v664_v49  ;;  %v670_v58 = vld [vmem:[#allocation8 + $0x100] sm:$0xff] }
  0xc7   : > { %1406 = vmatpush1.bf16.msra.mxu1 %v1405_v39  ;;  %v1411_v57 = vpack.c.bf16 %v675_v52, %v671_v51  ;;  %v674_v59 = vld [vmem:[#allocation8 + $0x120] sm:$0xff]  ;;  %v672_v60 = vld [vmem:[#allocation8 + $0x110] sm:$0xff]  ;;  %v1443_v61 = vpack.c.bf16 %v677_v54, %v673_v53  ;;  %v679_v63 = vld [vmem:[#allocation8 + $0x148] sm:$0xff] }
  0xc8   : > { %1408 = vmatprep.subr.bf16.mxu1 %v1407_v44  ;;  %v676_v62 = vld [vmem:[#allocation8 + $0x130] sm:$0xff]  ;;  %v683_v0 = vld [vmem:[#allocation8 + $0x168] sm:$0xff]  ;;  %v681_v1 = vld [vmem:[#allocation8 + $0x158] sm:$0xff]  ;;  %v1413_v3 = vpack.c.bf16 %v674_v59, %v670_v58 }
  0xc9   : > { %1438 = vmatpush1.bf16.msra.mxu0 %v1437_v43  ;;  %v685_v2 = vld [vmem:[#allocation8 + $0x178] sm:$0xff]  ;;  %v1445_v5 = vpack.c.bf16 %v676_v62, %v672_v60  ;;  %v1415_v6 = vpack.c.bf16 %v683_v0, %v679_v63  ;;  %v678_v7 = vld [vmem:[#allocation8 + $0x140] sm:$0xff]  ;;  %v680_v9 = vld [vmem:[#allocation8 + $0x150] sm:$0xff] }
  0xca   : > { %1440 = vmatprep.subr.bf16.mxu0 %v1439_v48  ;;  %v682_v8 = vld [vmem:[#allocation8 + $0x160] sm:$0xff]  ;;  %v1447_v10 = vpack.c.bf16 %v685_v2, %v681_v1  ;;  %v684_v11 = vld [vmem:[#allocation8 + $0x170] sm:$0xff]  ;;  %v687_v12 = vld [vmem:[#allocation8 + $0x188] sm:$0xff] }
  0xcb   : > { %1410 = vmatpush1.bf16.msra.mxu1 %v1409_v55  ;;  %v691_v13 = vld [vmem:[#allocation8 + $0x1a8] sm:$0xff]  ;;  %v689_v14 = vld [vmem:[#allocation8 + $0x198] sm:$0xff]  ;;  %v1417_v16 = vpack.c.bf16 %v682_v8, %v678_v7  ;;  %v1449_v17 = vpack.c.bf16 %v684_v11, %v680_v9  ;;  %v686_v19 = vld [vmem:[#allocation8 + $0x180] sm:$0xff] }
  0xcc   : > { %1412 = vmatprep.subr.bf16.mxu1 %v1411_v57  ;;  %v693_v15 = vld [vmem:[#allocation8 + $0x1b8] sm:$0xff]  ;;  %v1419_v18 = vpack.c.bf16 %v691_v13, %v687_v12  ;;  %v690_v20 = vld [vmem:[#allocation8 + $0x1a0] sm:$0xff]  ;;  %v688_v21 = vld [vmem:[#allocation8 + $0x190] sm:$0xff] }
  0xcd   : > { %1442 = vmatpush1.bf16.msra.mxu0 %v1441_v56  ;;  %v1451_v22 = vpack.c.bf16 %v693_v15, %v689_v14  ;;  %v692_v23 = vld [vmem:[#allocation8 + $0x1b0] sm:$0xff]  ;;  %v695_v24 = vld [vmem:[#allocation8 + $0x1c8] sm:$0xff]  ;;  %v697_v26 = vld [vmem:[#allocation8 + $0x1d8] sm:$0xff]  ;;  %v1421_v28 = vpack.c.bf16 %v690_v20, %v686_v19 }
  0xce   : > { %1444 = vmatprep.subr.bf16.mxu0 %v1443_v61  ;;  %v699_v25 = vld [vmem:[#allocation8 + $0x1e8] sm:$0xff]  ;;  %v701_v27 = vld [vmem:[#allocation8 + $0x1f8] sm:$0xff]  ;;  %v1453_v29 = vpack.c.bf16 %v692_v23, %v688_v21  ;;  %v694_v31 = vld [vmem:[#allocation8 + $0x1c0] sm:$0xff] }
  0xcf   : > { %1414 = vmatpush1.bf16.msra.mxu1 %v1413_v3  ;;  %v1423_v30 = vpack.c.bf16 %v699_v25, %v695_v24  ;;  %v698_v32 = vld [vmem:[#allocation8 + $0x1e0] sm:$0xff]  ;;  %v696_v33 = vld [vmem:[#allocation8 + $0x1d0] sm:$0xff]  ;;  %v1455_v34 = vpack.c.bf16 %v701_v27, %v697_v26  ;;  %v575_v36 = vld [vmem:[#allocation7 + $0x8] sm:$0xff] }
  0xd0   : > { %1416 = vmatprep.subr.bf16.mxu1 %v1415_v6  ;;  %v700_v35 = vld [vmem:[#allocation8 + $0x1f0] sm:$0xff]  ;;  %v579_v37 = vld [vmem:[#allocation7 + $0x28] sm:$0xff]  ;;  %v577_v38 = vld [vmem:[#allocation7 + $0x18] sm:$0xff]  ;;  %v1425_v40 = vpack.c.bf16 %v698_v32, %v694_v31 }
  0xd1   : > { %1446 = vmatpush1.bf16.msra.mxu0 %v1445_v5  ;;  %v581_v39 = vld [vmem:[#allocation7 + $0x38] sm:$0xff]  ;;  %v1457_v41 = vpack.c.bf16 %v700_v35, %v696_v33  ;;  %v1459_v42 = vpack.c.bf16 %v579_v37, %v575_v36  ;;  %v574_v43 = vld [vmem:[#allocation7] sm:$0xff]  ;;  %v576_v45 = vld [vmem:[#allocation7 + $0x10] sm:$0xff] }
  0xd2   : > { %1448 = vmatprep.subr.bf16.mxu0 %v1447_v10  ;;  %v578_v44 = vld [vmem:[#allocation7 + $0x20] sm:$0xff]  ;;  %v1491_v46 = vpack.c.bf16 %v581_v39, %v577_v38  ;;  %v580_v47 = vld [vmem:[#allocation7 + $0x30] sm:$0xff]  ;;  %v583_v48 = vld [vmem:[#allocation7 + $0x48] sm:$0xff] }
  0xd3   : > { %1418 = vmatpush1.bf16.msra.mxu1 %v1417_v16  ;;  %v587_v49 = vld [vmem:[#allocation7 + $0x68] sm:$0xff]  ;;  %v585_v50 = vld [vmem:[#allocation7 + $0x58] sm:$0xff]  ;;  %v489_v52 = vld [vmem:[#allocation12] sm:$0x3]  ;;  %v1461_v53 = vpack.c.bf16 %v578_v44, %v574_v43  ;;  %v1493_v54 = vpack.c.bf16 %v580_v47, %v576_v45 }
  0xd4   : > { %1420 = vmatprep.subr.bf16.mxu1 %v1419_v18  ;;  %v589_v51 = vld [vmem:[#allocation7 + $0x78] sm:$0xff]  ;;  %v1463_v55 = vpack.c.bf16 %v587_v49, %v583_v48  ;;  %v582_v56 = vld [vmem:[#allocation7 + $0x40] sm:$0xff]  ;;  %v584_v58 = vld [vmem:[#allocation7 + $0x50] sm:$0xff] }
  0xd5   : > { %1450 = vmatpush1.bf16.msra.mxu0 %v1449_v17  ;;  %v586_v57 = vld [vmem:[#allocation7 + $0x60] sm:$0xff]  ;;  %v1495_v59 = vpack.c.bf16 %v589_v51, %v585_v50  ;;  %v588_v60 = vld [vmem:[#allocation7 + $0x70] sm:$0xff]  ;;  %v591_v61 = vld [vmem:[#allocation7 + $0x88] sm:$0xff] }
  0xd6   : > { %1452 = vmatprep.subr.bf16.mxu0 %v1451_v22  ;;  %v595_v62 = vld [vmem:[#allocation7 + $0xa8] sm:$0xff]  ;;  %v593_v63 = vld [vmem:[#allocation7 + $0x98] sm:$0xff]  ;;  %v1465_v1 = vpack.c.bf16 %v586_v57, %v582_v56  ;;  %v1497_v2 = vpack.c.bf16 %v588_v60, %v584_v58  ;;  %v590_v5 = vld [vmem:[#allocation7 + $0x80] sm:$0xff] }
  0xd7   : > { %1422 = vmatpush1.bf16.msra.mxu1 %v1421_v28  ;;  %v597_v0 = vld [vmem:[#allocation7 + $0xb8] sm:$0xff]  ;;  %v1467_v3 = vpack.c.bf16 %v595_v62, %v591_v61  ;;  %v594_v6 = vld [vmem:[#allocation7 + $0xa0] sm:$0xff]  ;;  %v592_v7 = vld [vmem:[#allocation7 + $0x90] sm:$0xff] }
  0xd8   : > { %1424 = vmatprep.subr.bf16.mxu1 %v1423_v30  ;;  %v1499_v8 = vpack.c.bf16 %v597_v0, %v593_v63  ;;  %v596_v9 = vld [vmem:[#allocation7 + $0xb0] sm:$0xff]  ;;  %v599_v10 = vld [vmem:[#allocation7 + $0xc8] sm:$0xff]  ;;  %v601_v12 = vld [vmem:[#allocation7 + $0xd8] sm:$0xff]  ;;  %v1469_v14 = vpack.c.bf16 %v594_v6, %v590_v5 }
  0xd9   : > { %1454 = vmatpush1.bf16.msra.mxu0 %v1453_v29  ;;  %v603_v11 = vld [vmem:[#allocation7 + $0xe8] sm:$0xff]  ;;  %v605_v13 = vld [vmem:[#allocation7 + $0xf8] sm:$0xff]  ;;  %v1501_v15 = vpack.c.bf16 %v596_v9, %v592_v7  ;;  %v598_v17 = vld [vmem:[#allocation7 + $0xc0] sm:$0xff] }
  0xda   : > { %1456 = vmatprep.subr.bf16.mxu0 %v1455_v34  ;;  %v1471_v16 = vpack.c.bf16 %v603_v11, %v599_v10  ;;  %v602_v18 = vld [vmem:[#allocation7 + $0xe0] sm:$0xff]  ;;  %v600_v19 = vld [vmem:[#allocation7 + $0xd0] sm:$0xff]  ;;  %v1503_v20 = vpack.c.bf16 %v605_v13, %v601_v12  ;;  %v607_v22 = vld [vmem:[#allocation7 + $0x108] sm:$0xff] }
  0xdb   : > { %1426 = vmatpush1.bf16.msra.mxu1 %v1425_v40  ;;  %v604_v21 = vld [vmem:[#allocation7 + $0xf0] sm:$0xff]  ;;  %v611_v23 = vld [vmem:[#allocation7 + $0x128] sm:$0xff]  ;;  %v609_v24 = vld [vmem:[#allocation7 + $0x118] sm:$0xff]  ;;  %v1473_v26 = vpack.c.bf16 %v602_v18, %v598_v17 }
  0xdc   : > { %1460 = vmatprep.subr.bf16.mxu1 %v1459_v42  ;;  %v613_v25 = vld [vmem:[#allocation7 + $0x138] sm:$0xff]  ;;  %v1505_v27 = vpack.c.bf16 %v604_v21, %v600_v19  ;;  %v1475_v28 = vpack.c.bf16 %v611_v23, %v607_v22  ;;  %v606_v29 = vld [vmem:[#allocation7 + $0x100] sm:$0xff]  ;;  %v608_v31 = vld [vmem:[#allocation7 + $0x110] sm:$0xff] }
  0xdd   : > { %1458 = vmatpush1.bf16.msra.mxu0 %v1457_v41  ;;  %v610_v30 = vld [vmem:[#allocation7 + $0x120] sm:$0xff]  ;;  %v1507_v32 = vpack.c.bf16 %v613_v25, %v609_v24  ;;  %v612_v33 = vld [vmem:[#allocation7 + $0x130] sm:$0xff]  ;;  %v615_v34 = vld [vmem:[#allocation7 + $0x148] sm:$0xff] }
  0xde   : > { %1492 = vmatprep.subr.bf16.mxu0 %v1491_v46  ;;  %767 = vmatmul.mubr.f32.vlgmr.msra.gmra.mrb[0].mxu1 %v489_v52  ;;  %v619_v35 = vld [vmem:[#allocation7 + $0x168] sm:$0xff]  ;;  %v617_v36 = vld [vmem:[#allocation7 + $0x158] sm:$0xff]  ;;  %v1477_v38 = vpack.c.bf16 %v610_v30, %v606_v29  ;;  %v1509_v39 = vpack.c.bf16 %v612_v33, %v608_v31  ;;  %v614_v41 = vld [vmem:[#allocation7 + $0x140] sm:$0xff] }
  0xdf   : > { %1462 = vmatpush1.bf16.msra.mxu1 %v1461_v53  ;;  %908 = vmatprep.mubr.f32.mxu1 %v1962_v4  ;;  %v621_v37 = vld [vmem:[#allocation7 + $0x178] sm:$0xff]  ;;  %v1479_v40 = vpack.c.bf16 %v619_v35, %v615_v34  ;;  %v618_v42 = vld [vmem:[#allocation7 + $0x160] sm:$0xff]  ;;  %v616_v43 = vld [vmem:[#allocation7 + $0x150] sm:$0xff] }
  0xe0   : > { %838 = vmatmul.mubr.f32.vlgmr.msra.gmra.mrb[2].mxu0 %v489_v52  ;;  %1464 = vmatprep.subr.bf16.mxu1 %v1463_v55  ;;  %v1511_v44 = vpack.c.bf16 %v621_v37, %v617_v36  ;;  %v620_v45 = vld [vmem:[#allocation7 + $0x170] sm:$0xff]  ;;  %v623_v46 = vld [vmem:[#allocation7 + $0x188] sm:$0xff]  ;;  %v625_v48 = vld [vmem:[#allocation7 + $0x198] sm:$0xff]  ;;  %v1481_v50 = vpack.c.bf16 %v618_v42, %v614_v41  ;;  %v988_v37 = vlaneseq }
  0xe1   : > { %1494 = vmatpush1.bf16.msra.mxu0 %v1493_v54  ;;  %979 = vmatprep.mubr.f32.mxu0 %v1962_v4  ;;  %v627_v47 = vld [vmem:[#allocation7 + $0x1a8] sm:$0xff]  ;;  %v629_v49 = vld [vmem:[#allocation7 + $0x1b8] sm:$0xff]  ;;  %v1513_v51 = vpack.c.bf16 %v620_v45, %v616_v43  ;;  %v622_v53 = vld [vmem:[#allocation7 + $0x180] sm:$0xff] }
  0xe2   : > { %1496 = vmatprep.subr.bf16.mxu0 %v1495_v59  ;;  %v1483_v52 = vpack.c.bf16 %v627_v47, %v623_v46  ;;  %v626_v54 = vld [vmem:[#allocation7 + $0x1a0] sm:$0xff]  ;;  %v624_v55 = vld [vmem:[#allocation7 + $0x190] sm:$0xff]  ;;  %v1515_v56 = vpack.c.bf16 %v629_v49, %v625_v48  ;;  %v631_v58 = vld [vmem:[#allocation7 + $0x1c8] sm:$0xff] }
  0xe3   : > { %1466 = vmatpush1.bf16.msra.mxu1 %v1465_v1  ;;  %v628_v57 = vld [vmem:[#allocation7 + $0x1b0] sm:$0xff]  ;;  %v635_v59 = vld [vmem:[#allocation7 + $0x1e8] sm:$0xff]  ;;  %v633_v60 = vld [vmem:[#allocation7 + $0x1d8] sm:$0xff]  ;;  %v1485_v62 = vpack.c.bf16 %v626_v54, %v622_v53 }
  0xe4   : > { %1468 = vmatprep.subr.bf16.mxu1 %v1467_v3  ;;  %v637_v61 = vld [vmem:[#allocation7 + $0x1f8] sm:$0xff]  ;;  %v1517_v63 = vpack.c.bf16 %v628_v57, %v624_v55  ;;  %v1487_v0 = vpack.c.bf16 %v635_v59, %v631_v58  ;;  %v634_v3 = vld [vmem:[#allocation7 + $0x1e0] sm:$0xff]  ;;  %v632_v5 = vld [vmem:[#allocation7 + $0x1d0] sm:$0xff] }
  0xe5   : > { %1498 = vmatpush1.bf16.msra.mxu0 %v1497_v2  ;;  %v1519_v1 = vpack.c.bf16 %v637_v61, %v633_v60  ;;  %v630_v2 = vld [vmem:[#allocation7 + $0x1c0] sm:$0xff]  ;;  %v636_v7 = vld [vmem:[#allocation7 + $0x1f0] sm:$0xff]  ;;  %v1321_v9 = vld [vmem:[%s2381_s4] ss:$0 sm:$0xff] }
  0xe6   : > { %1500 = vmatprep.subr.bf16.mxu0 %v1499_v8  ;;  %v1489_v6 = vpack.c.bf16 %v634_v3, %v630_v2  ;;  %v1521_v8 = vpack.c.bf16 %v636_v7, %v632_v5  ;;  %v1036_v13 = vld [vmem:[#allocation10] sm:$0xff]  ;;  %v1038_v17 = vld [vmem:[#allocation10 + $0x10] sm:$0xff]  ;;  %v1039_v18 = vld [vmem:[#allocation10 + $0x18] sm:$0xff] }
  0xe7   : > { %1470 = vmatpush1.bf16.msra.mxu1 %v1469_v14  ;;  %v1037_v14 = vld [vmem:[#allocation10 + $0x8] sm:$0xff]  ;;  %v1527_v19 = vpack.c.bf16 %v1039_v18, %v1038_v17  ;;  %v1042_v23 = vld [vmem:[#allocation10 + $0x30] sm:$0xff]  ;;  %v1043_v24 = vld [vmem:[#allocation10 + $0x38] sm:$0xff] }
  0xe8   : > { %1472 = vmatprep.subr.bf16.mxu1 %v1471_v16  ;;  %v1964_v16 = vmov 0.0|0.0   ;;  %v1041_v21 = vld [vmem:[#allocation10 + $0x28] sm:$0xff]  ;;  %v1044_v25 = vld [vmem:[#allocation10 + $0x40] sm:$0xff]  ;;  %v1047_v29 = vld [vmem:[#allocation10 + $0x58] sm:$0xff] }
  0xe9   : > { %1502 = vmatpush1.bf16.msra.mxu0 %v1501_v15  ;;  %v1524_v15 = vpack.c.bf16 %v1037_v14, %v1036_v13  ;;  %v1048_v30 = vld [vmem:[#allocation10 + $0x60] sm:$0xff]  ;;  %v1050_v34 = vld [vmem:[#allocation10 + $0x70] sm:$0xff]  ;;  %v1051_v35 = vld [vmem:[#allocation10 + $0x78] sm:$0xff] }
  0xea   : > { %1504 = vmatprep.subr.bf16.mxu0 %v1503_v20  ;;  %v1040_v20 = vld [vmem:[#allocation10 + $0x20] sm:$0xff]  ;;  %v1545_v36 = vpack.c.bf16 %v1051_v35, %v1050_v34 }
  0xeb   : > { %1474 = vmatpush1.bf16.msra.mxu1 %v1473_v26  ;;  %v1530_v22 = vpack.c.bf16 %v1041_v21, %v1040_v20  ;;  %v1045_v26 = vld [vmem:[#allocation10 + $0x48] sm:$0xff] }
  0xec   : > { %1476 = vmatprep.subr.bf16.mxu1 %v1475_v28  ;;  %v1046_v28 = vld [vmem:[#allocation10 + $0x50] sm:$0xff] }
  0xed   : > { %1506 = vmatpush1.bf16.msra.mxu0 %v1505_v27  ;;  %v1536_v27 = vpack.c.bf16 %v1045_v26, %v1044_v25  ;;  %v1539_v31 = vpack.c.bf16 %v1047_v29, %v1046_v28 }
  0xee   : > { %1508 = vmatprep.subr.bf16.mxu0 %v1507_v32  ;;  %v1049_v32 = vld [vmem:[#allocation10 + $0x68] sm:$0xff] }
  0xef   : > { %1478 = vmatpush1.bf16.msra.mxu1 %v1477_v38  ;;  %v1542_v33 = vpack.c.bf16 %v1049_v32, %v1048_v30  ;;  %v989_v38 = vshrl.u32 %v988_v37, 7 }
  0xf0   : > { %1480 = vmatprep.subr.bf16.mxu1 %v1479_v40  ;;  %v986_v40 = vld [vmem:[%s2384_s7] sm:$0xf] }
  0xf1   : > { %1510 = vmatpush1.bf16.msra.mxu0 %v1509_v39  ;;  %v990_v39 = vsub.s32 0, %v989_v38  ;;  %v994_v41 = vsub.s32 1, %v989_v38  ;;  %v1002_v46 = vsub.s32 3, %v989_v38  ;;  %v998_v54 = vsub.s32 2, %v989_v38 }
  0xf2   : > { %1512 = vmatprep.subr.bf16.mxu0 %v1511_v44 }
  0xf3   : > { %1482 = vmatpush1.bf16.msra.mxu1 %v1481_v50  ;;  %v991_v42 = vrot.slane %v986_v40, %v990_v39  ;;  %v995_v43 = vrot.slane %v986_v40, %v994_v41  ;;  %v1003_v53 = vrot.slane %v986_v40, %v1002_v46 }
  0xf4   : > { %1484 = vmatprep.subr.bf16.mxu1 %v1483_v52 }
  0xf5   : > { %1514 = vmatpush1.bf16.msra.mxu0 %v1513_v51 }
  0xf6   : > { %1516 = vmatprep.subr.bf16.mxu0 %v1515_v56  ;;  %v999_v56 = vrot.slane %v986_v40, %v998_v54 }
  0xf7   : > { %1486 = vmatpush1.bf16.msra.mxu1 %v1485_v62 }
  0xf8   : > { %1488 = vmatprep.subr.bf16.mxu1 %v1487_v0 }
  0xf9   : > { %1518 = vmatpush1.bf16.msra.mxu0 %v1517_v63 }
  0xfa   : > { %1520 = vmatprep.subr.bf16.mxu0 %v1519_v1  ;;  %v490_v1 = vld [vmem:[#allocation14] sm:$0x3] }
  0xfb   : > { %1490 = vmatpush1.bf16.msra.mxu1 %v1489_v6 }
  0xfc   : > { %1523 = vmatprep.subr.bf16.mxu1 %v1964_v16 }
  0xfd   : > { %1522 = vmatpush1.bf16.msra.mxu0 %v1521_v8 }
 0x190   : > { %v570_v10 = vpop.f32.mrb[0].mxu0 }
 0x191   : > { %v571_v11 = vadd.f32 %v1321_v9, %v570_v10  ;;  %v1359_v12 = vpop.f32.mrb[1].mxu0 }
 0x193   : > { %909 = vmatmul.mubr.f32.vlgmr.msra.gmra.mrb[0].mxu1 %v571_v11  ;;  %980 = vmatmul.mubr.f32.vlgmr.msra.gmra.mrb[2].mxu0 %v571_v11 }
 0x194   : > { %1392 = vmatprep.mubr.msk.f32.mxu1 %vm1963_vm1, %v1962_v4  ;;  %1525 = vmatpush3.bf16.msra.mxu1 %v1524_v15  ;;  %v1533_v4 = vpack.c.bf16 %v1043_v24, %v1042_v23 }
 0x195   : > { %1526 = vmatprep.subr.bf16.mxu1 %v1964_v16 }
 0x198   : > { %1528 = vmatpush3.bf16.msra.mxu1 %v1527_v19 }
 0x199   : > { %1529 = vmatprep.subr.bf16.mxu1 %v1964_v16 }
 0x19c   : > { %1531 = vmatpush3.bf16.msra.mxu1 %v1530_v22 }
 0x19d   : > { %1532 = vmatprep.subr.bf16.mxu1 %v1964_v16 }
 0x1a0   : > { %1534 = vmatpush3.bf16.msra.mxu1 %v1533_v4 }
 0x1a1   : > { %1535 = vmatprep.subr.bf16.mxu1 %v1964_v16 }
 0x1a4   : > { %1537 = vmatpush3.bf16.msra.mxu1 %v1536_v27 }
 0x1a5   : > { %1538 = vmatprep.subr.bf16.mxu1 %v1964_v16 }
 0x1a8   : > { %1540 = vmatpush3.bf16.msra.mxu1 %v1539_v31 }
 0x1a9   : > { %1541 = vmatprep.subr.bf16.mxu1 %v1964_v16 }
 0x1ac   : > { %1543 = vmatpush3.bf16.msra.mxu1 %v1542_v33 }
 0x1ad   : > { %1544 = vmatprep.subr.bf16.mxu1 %v1964_v16 }
 0x1b0   : > { %1546 = vmatpush3.bf16.msra.mxu1 %v1545_v36 }
 0x266   : > { %v910_v44 = vpop.f32.mrb[0].mxu1  ;;  %v981_v45 = vpop.f32.mrb[2].mxu0 }
 0x267   : > { %v1008_v47 = vadd.f32 %v991_v42, %v910_v44  ;;  %v912_v48 = vpop.f32.mrb[1].mxu1  ;;  %v983_v49 = vpop.f32.mrb[3].mxu0  ;;  %v1010_v58 = vadd.f32 %v999_v56, %v981_v45 }
 0x268   : > { %v1009_v50 = vadd.f32 %v995_v43, %v912_v48  ;;  %v1011_v55 = vadd.f32 %v1003_v53, %v983_v49 }
 0x269   : > { %v1323_v51 = vmul.f32 -1.442695, %v1008_v47 }
 0x26a   : > { %v1324_v52 = vmul.f32 -1.442695, %v1009_v50  ;;  %v1325_v57 = vmul.f32 -1.442695, %v1011_v55 }
 0x26b   : > { %1659 = vpow2.f32 %v1323_v51 }
 0x26c   : > { %1661 = vpow2.f32 %v1324_v52 }
 0x26d   : > { %1663 = vpow2.f32 %v1325_v57 }
 0x26e   : > { %1665 = vtanh.f32 %v1010_v58 }
 0x275   : > { %v1660_v59 = vpop.eup %1659 }
 0x276   : > { %v1662_v60 = vpop.eup %1661  ;;  %v1015_v61 = vadd.f32 1.0, %v1660_v59 }
 0x277   : > { %v1021_v62 = vadd.f32 1.0, %v1662_v60  ;;  %v1664_v63 = vpop.eup %1663 }
 0x278   : > { %1667 = vrcp.f32 %v1015_v61  ;;  %v1666_v0 = vpop.eup %1665  ;;  %v1028_v6 = vadd.f32 1.0, %v1664_v63 }
 0x279   : > { %1669 = vrcp.f32 %v1021_v62 }
 0x27a   : > { %1671 = vrcp.f32 %v1028_v6 }
 0x282   : > { %v1668_v2 = vpop.eup %1667 }
 0x283   : > { %v1670_v3 = vpop.eup %1669  ;;  %v1032_v5 = vmul.f32 %v1668_v2, %v1666_v0 }
 0x284   : > { %v1031_v7 = vmul.f32 %v1670_v3, %v490_v1  ;;  %v1672_v9 = vpop.eup %1671 }
 0x286   : > { %v1033_v8 = vadd.f32 %v1032_v5, %v1031_v7 }
 0x288   : > { %1138 = vst [vmem:[#allocation14] sm:$0x3] %v1033_v8  ;;  %1673 = vtanh.f32 %v1033_v8 }
 0x292   : > { %v1674_v10 = vpop.eup %1673 }
 0x293   : > { %v1035_v11 = vmul.f32 %v1674_v10, %v1672_v9 }
 0x295   : > { %1393 = vmatmul.mubr.f32.vlgmr.msra.gmra.mrb[2].mxu1 %v1035_v11  ;;  %1137 = vst [vmem:[#allocation12] sm:$0x3] %v1035_v11 }
 0x296   : > { %1834 = shalt.err (!%p1831_p4)
}
 0x297   : > { %s1835_s18 = scalar_lea.hbm %s2388_s11, 32  ;;  %p2419_p13 = pmov %p2418_p11 }
 0x298   : > { %p1836_p10 = scmp.ne.s32.totalorder %s2388_s11, %s1835_s18  ;;  %p1841_p8 = scmp.lt.u32.totalorder %s1835_s18, %s2388_s11 }
 0x29a   : > { %p1837_p0 = pnand %p1836_p10, %p2419_p13 }
 0x29c   : > { %p1838_p2 = pneg %p1837_p0 }
 0x29e   : > { %p1843_p9 = pnand %p1841_p8, %p1838_p2 }
 0x2a0   : > { %1846 = shalt.err (!%p1843_p9)
}
 0x2a1   : > { %p2420_p6 = pmov %p2418_p11  ;;  %s1966_s15 = smov [#allocation14]  }
 0x2a2   : > { %s1175_s13 = sshll.u32 %s1966_s15, 4  ;;  %s1176_s13 = int_to_ptr.vmem [resolvable:$true] %s1175_s13 }
 0x2a3   : > { %1571 = dma.vmem_to_hbm [thread:$0]  (%p2420_p6), %s1165_s10, 32, %s2388_s11, [#allocation13]  }
 0x2a4   : > { %s1847_s6 = scalar_lea.vmem %s1176_s13, 32  ;;  %p2421_p12 = pmov %p2420_p6 }
 0x2a5   : > { %p1848_p11 = scmp.ne.s32.totalorder %s1176_s13, %s1847_s6  ;;  %p1854_p3 = scmp.lt.s32.totalorder %s1176_s13, %s1176_s13 }
 0x2a6   : > { %p1855_p1 = scmp.lt.s32.totalorder %s1847_s6, %s1847_s6 }
 0x2a7   : > { %p1849_p5 = pnand %p1848_p11, %p2421_p12 }
 0x2a8   : > { %p1856_p4 = por %p1855_p1, %p1854_p3 }
 0x2a9   : > { %p1850_p7 = pneg %p1849_p5 }
 0x2ab   : > { %p1857_p10 = pnand %p1856_p4, %p1850_p7 }
 0x2ad   : > { %1860 = shalt.err (!%p1857_p10)
}
 0x2ae   : > { %s1861_s2 = scalar_lea.hbm %s2389_s12, 32  ;;  %p2422_p0 = pmov %p2420_p6 }
 0x2af   : > { %p1862_p13 = scmp.ne.s32.totalorder %s2389_s12, %s1861_s2  ;;  %p1867_p9 = scmp.lt.u32.totalorder %s1861_s2, %s2389_s12 }
 0x2b1   : > { %p1863_p2 = pnand %p1862_p13, %p2422_p0 }
 0x2b3   : > { %p1864_p8 = pneg %p1863_p2 }
 0x2b5   : > { %p1869_p6 = pnand %p1867_p9, %p1864_p8 }
 0x2b7   : > { %1872 = shalt.err (!%p1869_p6)
}
 0x2b8   : > { %p2423_p11 = pmov %p2422_p0  ;;  %s2424_s25 = sld [smem:[#allocation23_spill]] }
 0x2b9   : > { %s1329_s18 = sshll.u32 %s2054_s27, 5  ;;  %s1153_s2 = sshll.u32 %s2260_s28, 4  ;;  %s2331_s2 = int_to_ptr.vmem [resolvable:$true] %s1153_s2 }
 0x2ba   : > { %1573 = dma.vmem_to_hbm [thread:$0]  (%p2423_p11), %s1176_s13, 32, %s2389_s12, [#allocation13]  }
 0x2bb   : > { %s2425_s10 = sld [smem:[#allocation24_spill]]  ;;  %s1140_s14 = scalar_lea.sflag [#allocation4], %s2244_s5 }
 0x2bc   : > { %s1873_s9 = scalar_lea.vmem %s2331_s2, 32  ;;  %p2426_p5 = scmp.ne.s32.totalorder %s2409_s16, 0 }
 0x2bd   : > { %p1874_p12 = scmp.ne.s32.totalorder %s2331_s2, %s1873_s9  ;;  %s1967_s30 = smov [#allocation11]  }
 0x2be   : > { %v1326_v12 = vld [vmem:[%s2424_s25] ss:$0 sm:$0xff]  ;;  %s1877_s15 = sshll.u32 %s1967_s30, 4  ;;  %s1878_s15 = int_to_ptr.vmem [resolvable:$false] %s1877_s15 }
 0x2bf   : > { %p1875_p7 = pnand %p1874_p12, %p2426_p5  ;;  %s1879_s6 = scalar_lea.vmem %s1878_s15, 64 }
 0x2c0   : > { %p1880_p1 = scmp.lt.s32.totalorder %s2331_s2, %s1878_s15  ;;  %p1881_p4 = scmp.lt.s32.totalorder %s1879_s6, %s1873_s9 }
 0x2c1   : > { %s2329_s20 = scalar_lea.hbm %s2425_s10, %s1329_s18  ;;  %p1876_p3 = pneg %p1875_p7 }
 0x2c2   : > { %p1882_p10 = por %p1881_p4, %p1880_p1 }
 0x2c4   : > { %p1883_p13 = pnand %p1882_p10, %p1876_p3 }
 0x368   : > { %v1125_v13 = vpop.f32.mrb[2].mxu1 }
 0x369   : > { %v1126_v14 = vadd.f32 %v1326_v12, %v1125_v13  ;;  %v1394_v15 = vpop.f32.mrb[3].mxu1 }
 0x36b   : > { %v1327_v16 = vmul.f32 -1.442695, %v1126_v14 }
 0x36d   : > { %1675 = vpow2.f32 %v1327_v16 }
 0x377   : > { %v1676_v17 = vpop.eup %1675 }
 0x378   : > { %v1132_v18 = vadd.f32 1.0, %v1676_v17 }
 0x37a   : > { %1677 = vrcp.f32 %v1132_v18 }
 0x384   : > { %v1678_v19 = vpop.eup %1677 }
 0x385   : > { %v1135_v20 = vmul.f32 2.5, %v1678_v19 }
 0x387   : > { %1136 = vst [vmem:[%s2260_s28] sm:$0x3] %v1135_v20 }
 0x388   : > { %1886 = shalt.err (!%p1883_p13)
}
 0x389   : > { %s1887_s5 = scalar_lea.hbm %s2329_s20, 32  ;;  %s1891_s18 = scalar_lea.hbm %s2425_s10, 256 }
 0x38a   : > { %p1888_p0 = scmp.ne.s32.totalorder %s2329_s20, %s1887_s5  ;;  %p1892_p9 = scmp.lt.u32.totalorder %s2329_s20, %s2425_s10 }
 0x38b   : > { %p1893_p6 = scmp.lt.u32.totalorder %s1891_s18, %s1887_s5  ;;  %p1895_p12 = scmp.lt.u32.totalorder %s1887_s5, %s2329_s20 }
 0x38c   : > { %p1889_p2 = pnand %p1888_p0, %p2426_p5 }
 0x38d   : > { %p1894_p11 = por %p1893_p6, %p1892_p9 }
 0x38e   : > { %p1890_p8 = pneg %p1889_p2 }
 0x38f   : > { %p1896_p7 = por %p1895_p12, %p1894_p11 }
 0x391   : > { %p1897_p3 = pnand %p1896_p7, %p1890_p8 }
 0x393   : > { %1900 = shalt.err (!%p1897_p3)
}
 0x394   : > { %1569 = dma.vmem_to_hbm [thread:$0]  (%p2426_p5), %s2331_s2, 32, %s2329_s20, %s1140_s14  }
 0x395   : > { %p2427_p1 = scmp.eq.s32.totalorder %s2054_s27, 7 }
 0x397   : > { %1930 = dma.done.wait (%p2427_p1), [#allocation13], 64   ;;  %p2428_p4 = pmov %p2427_p1 }
 0x399   : > { %1932 = vsyncadd (%p2428_p4), [#allocation13], 4294967232 }
 0x39a PF: > { %p1613_p10 = scmp.ge.s32.totalorder %s1951_s24, 2  ;;  %s1195_s9 = sand.u32 1, %s1939_s21  }
 0x39b   : > { %p2429_p13 = scmp.ne.s32.totalorder %s2410_s26, 0  ;;  %s1196_s30 = scalar_lea.sflag [#allocation4], %s1195_s9 }
 0x39d   : > { %p1597_p0 = pnand %p1613_p10, %p2429_p13 }
 0x39f   : > { %1934 = dma.done.wait (!%p1597_p0), %s1196_s30, 32  }
 0x3a0   : > { %1936 = vsyncadd (!%p1597_p0), %s1196_s30, 4294967264  ;;  %p29_p5 = scmp.ge.s32.totalorder %s2166_s17, 10   ;;  %s2430_s21 = smov %s1943_s22 }
 0x3a1   : > { %s2431_s22 = smov %s1947_s23  ;;  %s2432_s23 = smov %s2177_s29 }
 0x3a2   : > { %s2433_s24 = smov %s2166_s17  ;;  %31 = sbr.rel (!%p29_p5) target bundleno = 14 (0xe), region = 141 }
 0x3a9   :  { %1201 = vsyncpa [#allocation3], 1 }
 0x3aa   :  { %1203 = vsyncpa [#allocation3 + $0x1], 1 }
 0x3ab   :  { %1204 = vsyncpa [#allocation6], 1 }
 0x3ac   :  { %1205 = vsyncpa [#allocation9], 1 }
 0x3ad   :  { %1206 = vsyncpa [#allocation4], 1 }
 0x3ae   :  { %1208 = vsyncpa [#allocation4 + $0x1], 1 }
 0x3af   :  { %1209 = vsyncpa [#allocation13], 1 }

</bundles_post_ra>
